<compile_context>
chip_gen: v7x
topology: tpu7x:2x2x1
jax: 0.10.0
libtpu: 0.0.40
codegen_flags: <defaults>
</compile_context>

<pallas_src>
import jax
import jax.numpy as jnp
from jax.experimental import pallas as pl
from jax.experimental.pallas import tpu as pltpu


def _round_up(n, m):
    return ((n + m - 1) // m) * m


# ----------------------------- kernels -------------------------------------

def _make_kernel_prefused(split):
    """3-matmul kernel: extractor pre-fused into layer 1.  `split` = 2*Pp."""

    def kernel(x_ref, w01_ref, b01_ref, w2_ref, b2_ref,
               w3st_ref, w3c_ref, b3_ref, out_ref):
        x = x_ref[...]                                        # bf16 (TB, Ep)

        # Fused extractor + first layers of all three heads: [hs | ht | hc]
        h1 = jnp.maximum(
            jnp.dot(x, w01_ref[...], preferred_element_type=jnp.float32)
            + b01_ref[...], 0.0).astype(jnp.bfloat16)         # (TB, K2)

        h1_st = h1[:, :split]                                 # (TB, 2*Pp)
        h1_c = h1[:, split:]                                  # (TB, Cp)

        # Second layers of the s/t heads: blockdiag(ws2, wt2).  The domain
        # hidden (h1_c) bypasses this layer (its head has one hidden layer).
        h2_st = jnp.maximum(
            jnp.dot(h1_st, w2_ref[...], preferred_element_type=jnp.float32)
            + b2_ref[...], 0.0).astype(jnp.bfloat16)          # (TB, 2*Pp)

        # Final layers -> lane-dense packed output slab [s | t | c | pad]
        out_ref[...] = (
            jnp.dot(h2_st, w3st_ref[...], preferred_element_type=jnp.float32)
            + jnp.dot(h1_c, w3c_ref[...], preferred_element_type=jnp.float32)
            + b3_ref[...])

    return kernel


def _make_kernel_full(split):
    """4-matmul kernel: explicit extractor (used when pre-fusion adds MACs)."""

    def kernel(x_ref, we_ref, be_ref, w1_ref, b1_ref, w2_ref, b2_ref,
               w3st_ref, w3c_ref, b3_ref, out_ref):
        x = x_ref[...]

        feat = (jnp.dot(x, we_ref[...], preferred_element_type=jnp.float32)
                + be_ref[...]).astype(jnp.bfloat16)

        h1 = jnp.maximum(
            jnp.dot(feat, w1_ref[...], preferred_element_type=jnp.float32)
            + b1_ref[...], 0.0).astype(jnp.bfloat16)

        h1_st = h1[:, :split]
        h1_c = h1[:, split:]

        h2_st = jnp.maximum(
            jnp.dot(h1_st, w2_ref[...], preferred_element_type=jnp.float32)
            + b2_ref[...], 0.0).astype(jnp.bfloat16)

        out_ref[...] = (
            jnp.dot(h2_st, w3st_ref[...], preferred_element_type=jnp.float32)
            + jnp.dot(h1_c, w3c_ref[...], preferred_element_type=jnp.float32)
            + b3_ref[...])

    return kernel


# ------------------- parameter fusion / padding (one-time) -----------------

def build_fused_params(p, weight_dtype=jnp.bfloat16):
    """Fuse & zero-pad the raw per-layer parameters into the kernel operands."""
    E, H = p["we"].shape
    P = p["ws1"].shape[1]
    C = p["wc1"].shape[1]
    S = p["ws3"].shape[1]
    T = p["wt3"].shape[1]

    Ep = _round_up(E, 128)
    Hp = _round_up(H, 128)
    Pp = _round_up(P, 128)
    Cp = _round_up(C, 128)
    Op = _round_up(S + T + 2, 128)
    K2 = 2 * Pp + Cp                     # fused hidden width [s | t | c]
    f32 = jnp.float32

    def pad2(w, r, c):
        return jnp.pad(w, ((0, r - w.shape[0]), (0, c - w.shape[1])))

    we = pad2(p["we"], Ep, Hp)
    be = pad2(p["be"], 1, Hp)

    # Layer 1 of all heads, concatenated along the output axis.
    w1 = jnp.zeros((Hp, K2), f32)
    w1 = w1.at[:H, 0:P].set(p["ws1"])
    w1 = w1.at[:H, Pp:Pp + P].set(p["wt1"])
    w1 = w1.at[:H, 2 * Pp:2 * Pp + C].set(p["wc1"])
    b1 = jnp.zeros((1, K2), f32)
    b1 = b1.at[:, 0:P].set(p["bs1"])
    b1 = b1.at[:, Pp:Pp + P].set(p["bt1"])
    b1 = b1.at[:, 2 * Pp:2 * Pp + C].set(p["bc1"])

    # Layer 2: blockdiag(ws2, wt2) only — the identity pass-through for the
    # domain hidden has been dropped (review: pure wasted MXU work).
    w2 = jnp.zeros((2 * Pp, 2 * Pp), f32)
    w2 = w2.at[0:P, 0:P].set(p["ws2"])
    w2 = w2.at[Pp:Pp + P, Pp:Pp + P].set(p["wt2"])
    b2 = jnp.zeros((1, 2 * Pp), f32)
    b2 = b2.at[:, 0:P].set(p["bs2"])
    b2 = b2.at[:, Pp:Pp + P].set(p["bt2"])

    # Final layer split into the s/t block-diag part and the domain head part.
    w3_st = jnp.zeros((2 * Pp, Op), f32)
    w3_st = w3_st.at[0:P, 0:S].set(p["ws3"])
    w3_st = w3_st.at[Pp:Pp + P, S:S + T].set(p["wt3"])
    w3_c = jnp.zeros((Cp, Op), f32)
    w3_c = w3_c.at[0:C, S + T:S + T + 2].set(p["wc2"])
    b3 = jnp.zeros((1, Op), f32)
    b3 = b3.at[:, 0:S].set(p["bs3"])
    b3 = b3.at[:, S:S + T].set(p["bt3"])
    b3 = b3.at[:, S + T:S + T + 2].set(p["bc2"])

    # Pre-fuse the extractor into layer 1 when it reduces MACs per row
    # (always valid: no nonlinearity follows the extractor).
    prefuse = Ep * K2 < Ep * Hp + Hp * K2
    if prefuse:
        w01 = we @ w1                      # (Ep, K2), computed in f32
        b01 = be @ w1 + b1                 # (1, K2)
        fused = dict(w01=w01.astype(weight_dtype), b01=b01,
                     w2=w2.astype(weight_dtype), b2=b2,
                     w3_st=w3_st.astype(weight_dtype),
                     w3_c=w3_c.astype(weight_dtype), b3=b3)
    else:
        fused = dict(we=we.astype(weight_dtype), be=be,
                     w1=w1.astype(weight_dtype), b1=b1,
                     w2=w2.astype(weight_dtype), b2=b2,
                     w3_st=w3_st.astype(weight_dtype),
                     w3_c=w3_c.astype(weight_dtype), b3=b3)

    meta = dict(Ep=Ep, Hp=Hp, Pp=Pp, Cp=Cp, Op=Op, K2=K2, S=S, T=T,
                prefuse=prefuse, act_dtype=weight_dtype)
    return fused, meta


# ----------------------------- wrapper -------------------------------------

def _pick_batch_tiling(B, batch_tile):
    """Pick (TB, Bp): TB multiple of 8, minimal padding, and >=2 grid steps
    once the (padded) batch reaches 256 rows so the parallel batch axis can
    shard across v7x's two TensorCores."""
    cap = max(8, (batch_tile // 8) * 8)
    Bp8 = _round_up(B, 8)
    if Bp8 <= cap:
        if Bp8 >= 256:
            TB = _round_up((Bp8 + 1) // 2, 8)
            return TB, 2 * TB
        return Bp8, Bp8
    cands = [t for t in (128, 256, 512) if t <= cap] or [cap]
    TB = min(cands, key=lambda t: (_round_up(B, t) - B, -t))
    return TB, _round_up(B, TB)


def dann_forward(x, fused, meta, constant=1.0, batch_tile=512):
    """Run the fused DANN forward. `constant` only affects gradients (unused)."""
    del constant  # GradReverse is identity in the forward pass.
    B, E = x.shape
    Ep, Op, S, T = meta["Ep"], meta["Op"], meta["S"], meta["T"]
    split = 2 * meta["Pp"]

    TB, Bp = _pick_batch_tiling(B, batch_tile)
    x_p = jnp.pad(x, ((0, Bp - B), (0, Ep - E))).astype(meta["act_dtype"])

    if meta["prefuse"]:
        weights = (fused["w01"], fused["b01"], fused["w2"], fused["b2"],
                   fused["w3_st"], fused["w3_c"], fused["b3"])
        kernel = _make_kernel_prefused(split)
    else:
        weights = (fused["we"], fused["be"], fused["w1"], fused["b1"],
                   fused["w2"], fused["b2"],
                   fused["w3_st"], fused["w3_c"], fused["b3"])
        kernel = _make_kernel_full(split)

    def batch_spec(ncols):
        return pl.BlockSpec((TB, ncols), lambda i: (i, 0))

    def const_spec(a):
        return pl.BlockSpec(a.shape, lambda i: (0,) * a.ndim)

    # Cost estimate (matmul weights only; biases have a single row).
    matmul_macs = sum(int(w.shape[0]) * int(w.shape[1])
                      for w in weights if w.shape[0] > 1)
    flops = 2 * Bp * matmul_macs
    bytes_accessed = (x_p.size * x_p.dtype.itemsize
                      + sum(int(w.size) * w.dtype.itemsize for w in weights)
                      + Bp * Op * 4)
    cost = pl.CostEstimate(flops=flops, transcendentals=0,
                           bytes_accessed=bytes_accessed)

    # VMEM budget from the actual footprint (double-buffered operands +
    # intermediates), capped at a v7x-safe 48 MiB.  On 128-MiB v5e/v6e this
    # could be raised toward ~96 MiB if hidden dims / tiles grow.
    weight_bytes = sum(int(w.size) * w.dtype.itemsize for w in weights)
    stream_bytes = TB * Ep * x_p.dtype.itemsize + TB * Op * 4
    interm_bytes = TB * (meta["K2"] + split) * 6        # f32 + bf16 copies
    needed = 2 * (weight_bytes + stream_bytes) + interm_bytes
    vmem_limit = int(min(max(2 * needed, 32 << 20), 48 << 20))

    packed = pl.pallas_call(
        kernel,
        out_shape=jax.ShapeDtypeStruct((Bp, Op), jnp.float32),
        grid=(Bp // TB,),
        in_specs=[batch_spec(Ep)] + [const_spec(a) for a in weights],
        out_specs=pl.BlockSpec((TB, Op), lambda i: (i, 0)),
        compiler_params=pltpu.CompilerParams(
            dimension_semantics=("parallel",),     # megacore-shardable batch
            vmem_limit_bytes=vmem_limit),
        cost_estimate=cost,
    )(x_p, *weights)

    s_pre = packed[:B, 0:S]
    t_pre = packed[:B, S:S + T]
    c_pre = packed[:B, S + T:S + T + 2]
    return s_pre, t_pre, c_pre


# ------------------------- parameter construction --------------------------

def init_linear(key, fan_in, fan_out):
    """Deterministic PyTorch-style uniform init. Returns W:(in,out), b:(1,out)."""
    kw, kb = jax.random.split(key)
    bound = 1.0 / jnp.sqrt(fan_in)
    w = jax.random.uniform(kw, (fan_in, fan_out), jnp.float32, -bound, bound)
    b = jax.random.uniform(kb, (1, fan_out), jnp.float32, -bound, bound)
    return w, b


def make_params(key, embedding_size, e_hidden, p_hidden, c_hidden,
                snum_item, tnum_item):
    keys = jax.random.split(key, 9)
    p = {}
    p["we"], p["be"] = init_linear(keys[0], embedding_size, e_hidden)
    p["ws1"], p["bs1"] = init_linear(keys[1], e_hidden, p_hidden)
    p["ws2"], p["bs2"] = init_linear(keys[2], p_hidden, p_hidden)
    p["ws3"], p["bs3"] = init_linear(keys[3], p_hidden, snum_item)
    p["wt1"], p["bt1"] = init_linear(keys[4], e_hidden, p_hidden)
    p["wt2"], p["bt2"] = init_linear(keys[5], p_hidden, p_hidden)
    p["wt3"], p["bt3"] = init_linear(keys[6], p_hidden, tnum_item)
    p["wc1"], p["bc1"] = init_linear(keys[7], e_hidden, c_hidden)
    p["wc2"], p["bc2"] = init_linear(keys[8], c_hidden, 2)
    return p


# ------------------------------ reference ----------------------------------

def dann_reference(x, p):
    lin = lambda h, w, b: h @ w + b
    feat = lin(x, p["we"], p["be"])
    h = jax.nn.relu(lin(feat, p["ws1"], p["bs1"]))
    h = jax.nn.relu(lin(h, p["ws2"], p["bs2"]))
    s_pre = lin(h, p["ws3"], p["bs3"])
    h = jax.nn.relu(lin(feat, p["wt1"], p["bt1"]))
    h = jax.nn.relu(lin(h, p["wt2"], p["bt2"]))
    t_pre = lin(h, p["wt3"], p["bt3"])
    h = jax.nn.relu(lin(feat, p["wc1"], p["bc1"]))
    c_pre = lin(h, p["wc2"], p["bc2"])
    return s_pre, t_pre, c_pre


# -------------------------------- main --------------------------------------

if __name__ == "__main__":
    # Small shapes consistent with the module's forward:
    #   input: (batch, embedding_size)
    B, embedding_size, e_hidden, p_hidden, c_hidden = 8, 32, 32, 32, 32
    snum_item, tnum_item = 16, 16

    key = jax.random.PRNGKey(0)
    kx, kp = jax.random.split(key)
    x = jax.random.normal(kx, (B, embedding_size), jnp.float32)
    params = make_params(kp, embedding_size, e_hidden, p_hidden, c_hidden,
                         snum_item, tnum_item)

    fused, meta = build_fused_params(params)

    s_pre, t_pre, c_pre = dann_forward(x, fused, meta, constant=0.5)
    jax.block_until_ready((s_pre, t_pre, c_pre))

    s_ref, t_ref, c_ref = dann_reference(x, params)
    assert s_pre.shape == (B, snum_item)
    assert t_pre.shape == (B, tnum_item)
    assert c_pre.shape == (B, 2)
    # bf16 operands (f32 accumulation) -> loosened tolerance vs the f32 ref.
    assert jnp.allclose(s_pre, s_ref, atol=3e-2, rtol=3e-2)
    assert jnp.allclose(t_pre, t_ref, atol=3e-2, rtol=3e-2)
    assert jnp.allclose(c_pre, c_ref, atol=3e-2, rtol=3e-2)

    print("KERNEL_OK")
</pallas_src>

<mosaic_0001>
module attributes {stable_mosaic.version = 11 : i64} {
  func.func @kernel(%arg0: i32, %arg1: memref<8x128xbf16, #tpu.memory_space<vmem>>, %arg2: memref<128x384xbf16, #tpu.memory_space<vmem>>, %arg3: memref<1x384xf32, #tpu.memory_space<vmem>>, %arg4: memref<256x256xbf16, #tpu.memory_space<vmem>>, %arg5: memref<1x256xf32, #tpu.memory_space<vmem>>, %arg6: memref<256x128xbf16, #tpu.memory_space<vmem>>, %arg7: memref<128x128xbf16, #tpu.memory_space<vmem>>, %arg8: memref<1x128xf32, #tpu.memory_space<vmem>>, %arg9: memref<8x128xf32, #tpu.memory_space<vmem>>) attributes {dimension_semantics = [#tpu.dimension_semantics<parallel>], iteration_bounds = array<i64: 1>, scalar_prefetch = 0 : i64, scratch_operands = 0 : i64, tpu.core_type = #tpu.core_type<tc>, window_params = [{transform_indices = @transform_0, window_bounds = array<i64: 8, 128>}, {pipeline_mode = #tpu.pipeline_mode<synchronous>, transform_indices = @transform_1, window_bounds = array<i64: 128, 384>}, {pipeline_mode = #tpu.pipeline_mode<synchronous>, transform_indices = @transform_2, window_bounds = array<i64: 1, 384>}, {pipeline_mode = #tpu.pipeline_mode<synchronous>, transform_indices = @transform_3, window_bounds = array<i64: 256, 256>}, {pipeline_mode = #tpu.pipeline_mode<synchronous>, transform_indices = @transform_4, window_bounds = array<i64: 1, 256>}, {pipeline_mode = #tpu.pipeline_mode<synchronous>, transform_indices = @transform_5, window_bounds = array<i64: 256, 128>}, {pipeline_mode = #tpu.pipeline_mode<synchronous>, transform_indices = @transform_6, window_bounds = array<i64: 128, 128>}, {pipeline_mode = #tpu.pipeline_mode<synchronous>, transform_indices = @transform_7, window_bounds = array<i64: 1, 128>}, {transform_indices = @transform_8, window_bounds = array<i64: 8, 128>}]} {
    %c0 = arith.constant 0 : index
    %c0_0 = arith.constant 0 : index
    %0 = vector.load %arg1[%c0, %c0_0] : memref<8x128xbf16, #tpu.memory_space<vmem>>, vector<8x128xbf16>
    %c0_1 = arith.constant 0 : index
    %c0_2 = arith.constant 0 : index
    %1 = vector.load %arg2[%c0_1, %c0_2] : memref<128x384xbf16, #tpu.memory_space<vmem>>, vector<128x384xbf16>
    %cst = arith.constant dense<0.000000e+00> : vector<8x384xf32>
    %2 = tpu.matmul %0, %1, %cst {dimension_numbers = #tpu.dot_dimension_numbers<[1], [0], [0], [1], [0, 0, 1, 1], [], []>} : vector<8x128xbf16>, vector<128x384xbf16>, vector<8x384xf32> -> vector<8x384xf32>
    %c0_3 = arith.constant 0 : index
    %c0_4 = arith.constant 0 : index
    %3 = vector.load %arg3[%c0_3, %c0_4] : memref<1x384xf32, #tpu.memory_space<vmem>>, vector<1x384xf32>
    %4 = vector.broadcast %3 : vector<1x384xf32> to vector<8x384xf32>
    %5 = arith.addf %2, %4 : vector<8x384xf32>
    %cst_5 = arith.constant 0.000000e+00 : f32
    %6 = vector.broadcast %cst_5 : f32 to vector<8x384xf32>
    %7 = arith.maximumf %5, %6 : vector<8x384xf32>
    %8 = arith.truncf %7 : vector<8x384xf32> to vector<8x384xbf16>
    %9 = vector.extract_strided_slice %8 {offsets = [0, 0], sizes = [8, 256], strides = [1, 1]} : vector<8x384xbf16> to vector<8x256xbf16>
    %10 = vector.extract_strided_slice %8 {offsets = [0, 256], sizes = [8, 128], strides = [1, 1]} : vector<8x384xbf16> to vector<8x128xbf16>
    %c0_6 = arith.constant 0 : index
    %c0_7 = arith.constant 0 : index
    %11 = vector.load %arg4[%c0_6, %c0_7] : memref<256x256xbf16, #tpu.memory_space<vmem>>, vector<256x256xbf16>
    %cst_8 = arith.constant dense<0.000000e+00> : vector<8x256xf32>
    %12 = tpu.matmul %9, %11, %cst_8 {dimension_numbers = #tpu.dot_dimension_numbers<[1], [0], [0], [1], [0, 0, 1, 1], [], []>} : vector<8x256xbf16>, vector<256x256xbf16>, vector<8x256xf32> -> vector<8x256xf32>
    %c0_9 = arith.constant 0 : index
    %c0_10 = arith.constant 0 : index
    %13 = vector.load %arg5[%c0_9, %c0_10] : memref<1x256xf32, #tpu.memory_space<vmem>>, vector<1x256xf32>
    %14 = vector.broadcast %13 : vector<1x256xf32> to vector<8x256xf32>
    %15 = arith.addf %12, %14 : vector<8x256xf32>
    %cst_11 = arith.constant 0.000000e+00 : f32
    %16 = vector.broadcast %cst_11 : f32 to vector<8x256xf32>
    %17 = arith.maximumf %15, %16 : vector<8x256xf32>
    %18 = arith.truncf %17 : vector<8x256xf32> to vector<8x256xbf16>
    %c0_12 = arith.constant 0 : index
    %c0_13 = arith.constant 0 : index
    %19 = vector.load %arg6[%c0_12, %c0_13] : memref<256x128xbf16, #tpu.memory_space<vmem>>, vector<256x128xbf16>
    %cst_14 = arith.constant dense<0.000000e+00> : vector<8x128xf32>
    %20 = tpu.matmul %18, %19, %cst_14 {dimension_numbers = #tpu.dot_dimension_numbers<[1], [0], [0], [1], [0, 0, 1, 1], [], []>} : vector<8x256xbf16>, vector<256x128xbf16>, vector<8x128xf32> -> vector<8x128xf32>
    %c0_15 = arith.constant 0 : index
    %c0_16 = arith.constant 0 : index
    %21 = vector.load %arg7[%c0_15, %c0_16] : memref<128x128xbf16, #tpu.memory_space<vmem>>, vector<128x128xbf16>
    %cst_17 = arith.constant dense<0.000000e+00> : vector<8x128xf32>
    %22 = tpu.matmul %10, %21, %cst_17 {dimension_numbers = #tpu.dot_dimension_numbers<[1], [0], [0], [1], [0, 0, 1, 1], [], []>} : vector<8x128xbf16>, vector<128x128xbf16>, vector<8x128xf32> -> vector<8x128xf32>
    %23 = arith.addf %20, %22 : vector<8x128xf32>
    %c0_18 = arith.constant 0 : index
    %c0_19 = arith.constant 0 : index
    %24 = vector.load %arg8[%c0_18, %c0_19] : memref<1x128xf32, #tpu.memory_space<vmem>>, vector<1x128xf32>
    %25 = vector.broadcast %24 : vector<1x128xf32> to vector<8x128xf32>
    %26 = arith.addf %23, %25 : vector<8x128xf32>
    %c0_20 = arith.constant 0 : index
    %c0_21 = arith.constant 0 : index
    %27 = vector.load %arg9[%c0_20, %c0_21] : memref<8x128xf32, #tpu.memory_space<vmem>>, vector<8x128xf32>
    tpu.vector_store %arg9[%c0_20, %c0_21], %26 {strides = array<i32>} : memref<8x128xf32, #tpu.memory_space<vmem>>, vector<8x128xf32>,
    return
  }
  func.func @transform_0(%arg0: i32) -> (i32, i32) {
    %c0_i32 = arith.constant 0 : i32
    %c0_i32_0 = arith.constant 0 : i32
    return %arg0, %c0_i32 : i32, i32
  }
  func.func @transform_1(%arg0: i32) -> (i32, i32) {
    %c0_i32 = arith.constant 0 : i32
    %c0_i32_0 = arith.constant 0 : i32
    %c0_i32_1 = arith.constant 0 : i32
    return %c0_i32, %c0_i32_0 : i32, i32
  }
  func.func @transform_2(%arg0: i32) -> (i32, i32) {
    %c0_i32 = arith.constant 0 : i32
    %c0_i32_0 = arith.constant 0 : i32
    %c0_i32_1 = arith.constant 0 : i32
    return %c0_i32, %c0_i32_0 : i32, i32
  }
  func.func @transform_3(%arg0: i32) -> (i32, i32) {
    %c0_i32 = arith.constant 0 : i32
    %c0_i32_0 = arith.constant 0 : i32
    %c0_i32_1 = arith.constant 0 : i32
    return %c0_i32, %c0_i32_0 : i32, i32
  }
  func.func @transform_4(%arg0: i32) -> (i32, i32) {
    %c0_i32 = arith.constant 0 : i32
    %c0_i32_0 = arith.constant 0 : i32
    %c0_i32_1 = arith.constant 0 : i32
    return %c0_i32, %c0_i32_0 : i32, i32
  }
  func.func @transform_5(%arg0: i32) -> (i32, i32) {
    %c0_i32 = arith.constant 0 : i32
    %c0_i32_0 = arith.constant 0 : i32
    %c0_i32_1 = arith.constant 0 : i32
    return %c0_i32, %c0_i32_0 : i32, i32
  }
  func.func @transform_6(%arg0: i32) -> (i32, i32) {
    %c0_i32 = arith.constant 0 : i32
    %c0_i32_0 = arith.constant 0 : i32
    %c0_i32_1 = arith.constant 0 : i32
    return %c0_i32, %c0_i32_0 : i32, i32
  }
  func.func @transform_7(%arg0: i32) -> (i32, i32) {
    %c0_i32 = arith.constant 0 : i32
    %c0_i32_0 = arith.constant 0 : i32
    %c0_i32_1 = arith.constant 0 : i32
    return %c0_i32, %c0_i32_0 : i32, i32
  }
  func.func @transform_8(%arg0: i32) -> (i32, i32) {
    %c0_i32 = arith.constant 0 : i32
    %c0_i32_0 = arith.constant 0 : i32
    return %arg0, %c0_i32 : i32, i32
  }
}

</mosaic_0001>

<bundles_post_ra>
// kernel: tpu_custom_call.1
= control target key start
LH: loop header
LB: loop body
LE: loop exit
PB: predicated region body
PF: predicated region fallthrough
CT: control target
= control target key end

     0   :  { %13 = vsyncpa [#allocation3], 0  ;;  %s1503_s0 = inlined_call_operand.hbm [shape: bf16[8,128], index: 0, kind: input, shape index: {}]   ;;  %s1504_s1 = inlined_call_operand.hbm [shape: bf16[128,384], index: 1, kind: input, shape index: {}]   ;;  %s1505_s2 = inlined_call_operand.vmem [shape: f32[1,384], index: 2, kind: input, shape index: {}]   ;;  %s1506_s3 = inlined_call_operand.hbm [shape: bf16[256,256], index: 3, kind: input, shape index: {}]   ;;  %s1507_s4 = inlined_call_operand.vmem [shape: f32[1,256], index: 4, kind: input, shape index: {}]   ;;  %s1508_s5 = inlined_call_operand.hbm [shape: bf16[256,128], index: 5, kind: input, shape index: {}]   ;;  %s1509_s6 = inlined_call_operand.hbm [shape: bf16[128,128], index: 6, kind: input, shape index: {}]   ;;  %s1510_s7 = inlined_call_operand.vmem [shape: f32[1,128], index: 7, kind: input, shape index: {}]   ;;  %s1511_s8 = inlined_call_operand.hbm [shape: f32[8,128], index: 8, kind: output, shape index: {}]  }
   0x1   :  { %14 = vsyncpa [#allocation6], 0 }
   0x2   :  { %15 = vsyncpa [#allocation9], 0 }
   0x3   :  { %16 = vsyncpa [#allocation4], 0  ;;  %s1329_s27 = smov [#allocation5]   ;;  %s1189_s9 = scalar_lea.hbm %s1504_s1, 3072 }
   0x4   :  { %s32_s28 = sshll.u32 %s1329_s27, 4  ;;  %p1190_p0 = scmp.ne.s32.totalorder %s1504_s1, %s1189_s9  ;;  %s33_s28 = int_to_ptr.vmem [resolvable:$true] %s32_s28 }
   0x5   :  { %p1193_p1 = scmp.lt.u32.totalorder %s1189_s9, %s1504_s1 }
   0x7   :  { %p1195_p2 = pnand %p1193_p1, %p1190_p0 }
   0x9   :  { %1198 = shalt.err (!%p1195_p2)
}
   0xa   :  { %s1199_s14 = scalar_lea.vmem %s33_s28, 3072  ;;  %p1204_p4 = scmp.lt.s32.totalorder %s33_s28, %s33_s28 }
   0xb   :  { %p1200_p3 = scmp.ne.s32.totalorder %s33_s28, %s1199_s14  ;;  %p1205_p5 = scmp.lt.s32.totalorder %s1199_s14, %s1199_s14 }
   0xd   :  { %p1206_p6 = por %p1205_p5, %p1204_p4 }
   0xf   :  { %p1207_p7 = pnand %p1206_p6, %p1200_p3 }
  0x11   :  { %1210 = shalt.err (!%p1207_p7)
}
  0x12   :  { %s1330_s15 = smov 192   ;;  %s1331_s16 = smov 12  }
  0x13   :  { %38 = dma.hbm_to_vmem [thread:$0]  %s1504_s1, 3072, %s33_s28, [#allocation6], %s1330_s15, %s1330_s15, %s1331_s16  }
  0x14   :  { %s1332_s19 = smov [#allocation8]   ;;  %s1211_s23 = scalar_lea.hbm %s1508_s5, 2048 }
  0x15   :  { %s60_s20 = sshll.u32 %s1332_s19, 4  ;;  %p1212_p8 = scmp.ne.s32.totalorder %s1508_s5, %s1211_s23  ;;  %s61_s20 = int_to_ptr.vmem [resolvable:$true] %s60_s20 }
  0x16   :  { %p1215_p9 = scmp.lt.u32.totalorder %s1211_s23, %s1508_s5 }
  0x18   :  { %p1217_p10 = pnand %p1215_p9, %p1212_p8 }
  0x1a   :  { %1220 = shalt.err (!%p1217_p10)
}
  0x1b   :  { %s1221_s29 = scalar_lea.vmem %s61_s20, 2048  ;;  %p1226_p12 = scmp.lt.s32.totalorder %s61_s20, %s61_s20 }
  0x1c   :  { %p1222_p11 = scmp.ne.s32.totalorder %s61_s20, %s1221_s29  ;;  %p1227_p13 = scmp.lt.s32.totalorder %s1221_s29, %s1221_s29 }
  0x1e   :  { %p1228_p0 = por %p1227_p13, %p1226_p12 }
  0x20   :  { %p1229_p1 = pnand %p1228_p0, %p1222_p11 }
  0x22   :  { %1232 = shalt.err (!%p1229_p1)
}
  0x23   :  { %s1333_s1 = smov 64   ;;  %s1334_s28 = smov 4  }
  0x24   :  { %66 = dma.hbm_to_vmem [thread:$0]  %s1508_s5, 2048, %s61_s20, [#allocation9], %s1333_s1, %s1333_s1, %s1334_s28  }
  0x25   :  { %s1335_s10 = smov [#allocation2]   ;;  %s1336_s12 = smov [#allocation7]  }
  0x26   :  { %s23_s11 = sshll.u32 %s1335_s10, 4  ;;  %s46_s13 = sshll.u32 %s1336_s12, 4  ;;  %s24_s11 = int_to_ptr.vmem [resolvable:$true] %s23_s11  ;;  %s1416_s13 = int_to_ptr.vmem [resolvable:$true] %s46_s13 }
  0x27   :  { %s1233_s16 = scalar_lea.hbm %s1503_s0, 64 }
  0x28   :  { %p1234_p2 = scmp.ne.s32.totalorder %s1503_s0, %s1233_s16  ;;  %p1237_p3 = scmp.lt.u32.totalorder %s1233_s16, %s1503_s0 }
  0x2a   :  { %p1239_p4 = pnand %p1237_p3, %p1234_p2 }
  0x2c   :  { %1242 = shalt.err (!%p1239_p4)
}
  0x2d   :  { %s1243_s5 = scalar_lea.vmem %s24_s11, 64  ;;  %p1248_p6 = scmp.lt.s32.totalorder %s24_s11, %s24_s11 }
  0x2e   :  { %p1244_p5 = scmp.ne.s32.totalorder %s24_s11, %s1243_s5  ;;  %p1249_p7 = scmp.lt.s32.totalorder %s1243_s5, %s1243_s5 }
  0x30   :  { %p1250_p8 = por %p1249_p7, %p1248_p6 }
  0x32   :  { %p1251_p9 = pnand %p1250_p8, %p1244_p5 }
  0x34   :  { %1254 = shalt.err (!%p1251_p9)
}
  0x35   :  { %26 = dma.hbm_to_vmem [thread:$0]  %s1503_s0, 64, %s24_s11, [#allocation3]  }
  0x36   :  { %s1255_s25 = scalar_lea.hbm %s1506_s3, 4096 }
  0x37   :  { %p1256_p10 = scmp.ne.s32.totalorder %s1506_s3, %s1255_s25  ;;  %p1259_p11 = scmp.lt.u32.totalorder %s1255_s25, %s1506_s3 }
  0x39   :  { %p1261_p12 = pnand %p1259_p11, %p1256_p10 }
  0x3b   :  { %1264 = shalt.err (!%p1261_p12)
}
  0x3c   :  { %s1265_s9 = scalar_lea.vmem %s1416_s13, 4096  ;;  %p1270_p0 = scmp.lt.s32.totalorder %s1416_s13, %s1416_s13 }
  0x3d   :  { %p1266_p13 = scmp.ne.s32.totalorder %s1416_s13, %s1265_s9  ;;  %p1271_p1 = scmp.lt.s32.totalorder %s1265_s9, %s1265_s9 }
  0x3f   :  { %p1272_p2 = por %p1271_p1, %p1270_p0 }
  0x41   :  { %p1273_p3 = pnand %p1272_p2, %p1266_p13 }
  0x43   :  { %1276 = shalt.err (!%p1273_p3)
}
  0x44   :  { %s1337_s0 = smov 128   ;;  %s1338_s10 = smov 8  }
  0x45   :  { %52 = dma.hbm_to_vmem [thread:$0]  %s1506_s3, 4096, %s1416_s13, [#allocation6], %s1337_s0, %s1337_s0, %s1338_s10  }
  0x46   :  { %s1339_s14 = smov [#allocation10]   ;;  %s1277_s18 = scalar_lea.hbm %s1509_s6, 1024 }
  0x47   :  { %s72_s15 = sshll.u32 %s1339_s14, 4  ;;  %p1278_p4 = scmp.ne.s32.totalorder %s1509_s6, %s1277_s18  ;;  %s73_s15 = int_to_ptr.vmem [resolvable:$true] %s72_s15 }
  0x48   :  { %p1281_p5 = scmp.lt.u32.totalorder %s1277_s18, %s1509_s6 }
  0x4a   :  { %p1283_p6 = pnand %p1281_p5, %p1278_p4 }
  0x4c   :  { %1286 = shalt.err (!%p1283_p6)
}
  0x4d   :  { %s1287_s22 = scalar_lea.vmem %s73_s15, 1024  ;;  %p1292_p8 = scmp.lt.s32.totalorder %s73_s15, %s73_s15 }
  0x4e   :  { %p1288_p7 = scmp.ne.s32.totalorder %s73_s15, %s1287_s22  ;;  %p1293_p9 = scmp.lt.s32.totalorder %s1287_s22, %s1287_s22 }
  0x50   :  { %p1294_p10 = por %p1293_p9, %p1292_p8 }
  0x52   :  { %p1295_p11 = pnand %p1294_p10, %p1288_p7 }
  0x54   :  { %1298 = shalt.err (!%p1295_p11)
}
  0x55   :  { %78 = dma.hbm_to_vmem [thread:$0]  %s1509_s6, 1024, %s73_s15, [#allocation9], %s1333_s1, %s1333_s1, %s1334_s28  }
  0x56   :  { %1321 = dma.done.wait [#allocation3], 64  }
  0x57   :  { %1322 = vsyncadd [#allocation3], 4294967232 }
  0x58   :  { %1323 = dma.done.wait [#allocation6], 7168  }
  0x59   :  { %1324 = vsyncadd [#allocation6], 4294960128 }
  0x5a   :  { %1325 = dma.done.wait [#allocation9], 3072  }
  0x5b   :  { %1326 = vsyncadd [#allocation9], 4294964224  ;;  %v1340_v0 = vmov 0   ;;  %v1341_v1 = vmov 0.0   ;;  %vm1342_vm0 = vmmov 0   ;;  %v1165_v59 = vld [vmem:[#allocation10] sm:$0xff]  }
  0x5c   :  { %307 = vmatprep.mubr.bf16.mxu0 %v1340_v0  ;;  %1030 = vmatprep.subr.bf16.mxu1 %v1341_v1  ;;  %v1085_v2 = vld [vmem:[#allocation5 + $0x4] ss:$12 sps:$4 sm:$0xff]   ;;  %v1087_v3 = vld [vmem:[#allocation5] ss:$12 sps:$4 sm:$0xff]   ;;  %v1088_v4 = vld [vmem:[#allocation5 + $0x1c] ss:$12 sps:$4 sm:$0xff]  }
  0x5d   :  { %1046 = vmatprep.mubr.msk.bf16.mxu1 %vm1342_vm0, %v1341_v1  ;;  %275 = vmatprep.subr.bf16.mxu0 %v1085_v2  ;;  %v1090_v5 = vld [vmem:[#allocation5 + $0x18] ss:$12 sps:$4 sm:$0xff]   ;;  %v1091_v6 = vld [vmem:[#allocation5 + $0x34] ss:$12 sps:$4 sm:$0xff]   ;;  %v1093_v7 = vld [vmem:[#allocation5 + $0x30] ss:$12 sps:$4 sm:$0xff]  }
  0x5e   :  { %276 = vmatpush1.bf16.msra.mxu0 %v1087_v3  ;;  %v1094_v8 = vld [vmem:[#allocation5 + $0x4c] ss:$12 sps:$4 sm:$0xff]   ;;  %v1096_v9 = vld [vmem:[#allocation5 + $0x48] ss:$12 sps:$4 sm:$0xff]   ;;  %v1097_v10 = vld [vmem:[#allocation5 + $0x64] ss:$12 sps:$4 sm:$0xff]  }
  0x5f   :  { %277 = vmatprep.subr.bf16.mxu0 %v1088_v4  ;;  %v1112_v11 = vld [vmem:[#allocation5 + $0x8] ss:$12 sps:$4 sm:$0xff]   ;;  %v1099_v12 = vld [vmem:[#allocation5 + $0x60] ss:$12 sps:$4 sm:$0xff]   ;;  %v1102_v15 = vld [vmem:[#allocation5 + $0x78] ss:$12 sps:$4 sm:$0xff]  }
  0x60   :  { %1031 = vmatpush3.bf16.msra.mxu1 %v1112_v11  ;;  %v1116_v13 = vld [vmem:[#allocation5 + $0x20] ss:$12 sps:$4 sm:$0xff]   ;;  %v1100_v14 = vld [vmem:[#allocation5 + $0x7c] ss:$12 sps:$4 sm:$0xff]   ;;  %v1120_v16 = vld [vmem:[#allocation5 + $0x38] ss:$12 sps:$4 sm:$0xff]  }
  0x61   :  { %1032 = vmatprep.subr.bf16.mxu1 %v1341_v1  ;;  %v1103_v17 = vld [vmem:[#allocation5 + $0x94] ss:$12 sps:$4 sm:$0xff]   ;;  %v1105_v18 = vld [vmem:[#allocation5 + $0x90] ss:$12 sps:$4 sm:$0xff]   ;;  %v1106_v20 = vld [vmem:[#allocation5 + $0xac] ss:$12 sps:$4 sm:$0xff]  }
  0x62   :  { %278 = vmatpush1.bf16.msra.mxu0 %v1090_v5  ;;  %v1124_v19 = vld [vmem:[#allocation5 + $0x50] ss:$12 sps:$4 sm:$0xff]   ;;  %v1108_v21 = vld [vmem:[#allocation5 + $0xa8] ss:$12 sps:$4 sm:$0xff]   ;;  %v1111_v23 = vld [vmem:[#allocation7 + $0x4] ss:$8 sps:$4 sm:$0xff]   ;;  %v132_v5 = vlaneseq }
  0x63   :  { %279 = vmatprep.subr.bf16.mxu0 %v1091_v6  ;;  %v1128_v22 = vld [vmem:[#allocation5 + $0x68] ss:$12 sps:$4 sm:$0xff]   ;;  %v97_v24 = vld [vmem:[#allocation2] sm:$0xf]  ;;  %v1132_v26 = vld [vmem:[#allocation5 + $0x80] ss:$12 sps:$4 sm:$0xff]  }
  0x64   :  { %1033 = vmatpush3.bf16.msra.mxu1 %v1116_v13  ;;  %v1109_v25 = vld [vmem:[#allocation7] ss:$8 sps:$4 sm:$0xff]   ;;  %v1115_v27 = vld [vmem:[#allocation7 + $0x14] ss:$8 sps:$4 sm:$0xff]   ;;  %v1113_v28 = vld [vmem:[#allocation7 + $0x10] ss:$8 sps:$4 sm:$0xff]  }
  0x65   :  { %1034 = vmatprep.subr.bf16.mxu1 %v1341_v1  ;;  %v1136_v29 = vld [vmem:[#allocation5 + $0x98] ss:$12 sps:$4 sm:$0xff]   ;;  %v1117_v31 = vld [vmem:[#allocation7 + $0x20] ss:$8 sps:$4 sm:$0xff]   ;;  %v1140_v32 = vld [vmem:[#allocation5 + $0xb0] ss:$12 sps:$4 sm:$0xff]  }
  0x66   :  { %280 = vmatpush1.bf16.msra.mxu0 %v1093_v7  ;;  %v1119_v30 = vld [vmem:[#allocation7 + $0x24] ss:$8 sps:$4 sm:$0xff]   ;;  %v1123_v33 = vld [vmem:[#allocation7 + $0x34] ss:$8 sps:$4 sm:$0xff]   ;;  %v1121_v34 = vld [vmem:[#allocation7 + $0x30] ss:$8 sps:$4 sm:$0xff]  }
  0x67   :  { %281 = vmatprep.subr.bf16.mxu0 %v1094_v8  ;;  %v1127_v35 = vld [vmem:[#allocation7 + $0x44] ss:$8 sps:$4 sm:$0xff]   ;;  %v1125_v36 = vld [vmem:[#allocation7 + $0x40] ss:$8 sps:$4 sm:$0xff]   ;;  %v1131_v37 = vld [vmem:[#allocation7 + $0x54] ss:$8 sps:$4 sm:$0xff]  }
  0x68   :  { %1035 = vmatpush3.bf16.msra.mxu1 %v1120_v16  ;;  %v1129_v38 = vld [vmem:[#allocation7 + $0x50] ss:$8 sps:$4 sm:$0xff]   ;;  %v1135_v39 = vld [vmem:[#allocation7 + $0x64] ss:$8 sps:$4 sm:$0xff]   ;;  %v1133_v40 = vld [vmem:[#allocation7 + $0x60] ss:$8 sps:$4 sm:$0xff]  }
  0x69   :  { %1036 = vmatprep.subr.bf16.mxu1 %v1341_v1  ;;  %v1139_v41 = vld [vmem:[#allocation7 + $0x74] ss:$8 sps:$4 sm:$0xff]   ;;  %v1137_v42 = vld [vmem:[#allocation7 + $0x70] ss:$8 sps:$4 sm:$0xff]   ;;  %v1143_v43 = vld [vmem:[#allocation7 + $0x84] ss:$8 sps:$4 sm:$0xff]  }
  0x6a   :  { %282 = vmatpush1.bf16.msra.mxu0 %v1096_v9  ;;  %v1141_v44 = vld [vmem:[#allocation7 + $0x80] ss:$8 sps:$4 sm:$0xff]   ;;  %v1146_v45 = vld [vmem:[#allocation7 + $0x94] ss:$8 sps:$4 sm:$0xff]   ;;  %v1144_v46 = vld [vmem:[#allocation7 + $0x90] ss:$8 sps:$4 sm:$0xff]  }
  0x6b   :  { %283 = vmatprep.subr.bf16.mxu0 %v1097_v10  ;;  %v1149_v47 = vld [vmem:[#allocation7 + $0xa4] ss:$8 sps:$4 sm:$0xff]   ;;  %v1147_v48 = vld [vmem:[#allocation7 + $0xa0] ss:$8 sps:$4 sm:$0xff]   ;;  %v1152_v49 = vld [vmem:[#allocation7 + $0xb4] ss:$8 sps:$4 sm:$0xff]  }
  0x6c   :  { %1037 = vmatpush3.bf16.msra.mxu1 %v1124_v19  ;;  %v1150_v50 = vld [vmem:[#allocation7 + $0xb0] ss:$8 sps:$4 sm:$0xff]   ;;  %v1155_v51 = vld [vmem:[#allocation7 + $0xc4] ss:$8 sps:$4 sm:$0xff]   ;;  %v1153_v52 = vld [vmem:[#allocation7 + $0xc0] ss:$8 sps:$4 sm:$0xff]  }
  0x6d   :  { %1038 = vmatprep.subr.bf16.mxu1 %v1341_v1  ;;  %v1158_v53 = vld [vmem:[#allocation7 + $0xd4] ss:$8 sps:$4 sm:$0xff]   ;;  %v1156_v54 = vld [vmem:[#allocation7 + $0xd0] ss:$8 sps:$4 sm:$0xff]   ;;  %v1161_v55 = vld [vmem:[#allocation7 + $0xe4] ss:$8 sps:$4 sm:$0xff]  }
  0x6e   :  { %284 = vmatpush1.bf16.msra.mxu0 %v1099_v12  ;;  %v1159_v56 = vld [vmem:[#allocation7 + $0xe0] ss:$8 sps:$4 sm:$0xff]   ;;  %v1164_v57 = vld [vmem:[#allocation7 + $0xf4] ss:$8 sps:$4 sm:$0xff]   ;;  %v1162_v58 = vld [vmem:[#allocation7 + $0xf0] ss:$8 sps:$4 sm:$0xff]  }
  0x6f   :  { %285 = vmatprep.subr.bf16.mxu0 %v1100_v14  ;;  %v1166_v60 = vld [vmem:[#allocation10 + $0x8] sm:$0xff]   ;;  %v1167_v61 = vld [vmem:[#allocation10 + $0x10] sm:$0xff]   ;;  %v1168_v62 = vld [vmem:[#allocation10 + $0x18] sm:$0xff]   ;;  %v133_v6 = vshrl.u32 %v132_v5, 7  ;;  %s1343_s24 = smov [#allocation11]  }
  0x70   :  { %1039 = vmatpush3.bf16.msra.mxu1 %v1128_v22  ;;  %v1169_v63 = vld [vmem:[#allocation10 + $0x20] sm:$0xff]   ;;  %v1170_v0 = vld [vmem:[#allocation10 + $0x28] sm:$0xff]   ;;  %v1171_v2 = vld [vmem:[#allocation10 + $0x30] sm:$0xff]   ;;  %s898_s25 = sshll.u32 %s1343_s24, 4  ;;  %s899_s25 = int_to_ptr.vmem [resolvable:$true] %s898_s25 }
  0x71   :  { %1040 = vmatprep.subr.bf16.mxu1 %v1341_v1  ;;  %v1172_v3 = vld [vmem:[#allocation10 + $0x38] sm:$0xff]   ;;  %v1173_v4 = vld [vmem:[#allocation8 + $0x40] sm:$0xff]   ;;  %v134_v7 = vsub.s32 0, %v133_v6  ;;  %v138_v9 = vsub.s32 1, %v133_v6  ;;  %v142_v19 = vsub.s32 2, %v133_v6  ;;  %s1299_s26 = scalar_lea.vmem %s899_s25, 128  ;;  %p1304_p13 = scmp.lt.s32.totalorder %s899_s25, %s899_s25 }
  0x72   :  { %286 = vmatpush1.bf16.msra.mxu0 %v1102_v15  ;;  %v130_v8 = vld [vmem:[%s1505_s2] sm:$0x7]  ;;  %p1300_p12 = scmp.ne.s32.totalorder %s899_s25, %s1299_s26  ;;  %p1305_p0 = scmp.lt.s32.totalorder %s1299_s26, %s1299_s26 }
  0x73   :  { %287 = vmatprep.subr.bf16.mxu0 %v1103_v17  ;;  %v135_v10 = vrot.slane %v130_v8, %v134_v7  ;;  %v139_v11 = vrot.slane %v130_v8, %v138_v9  ;;  %v143_v22 = vrot.slane %v130_v8, %v142_v19 }
  0x74   :  { %1041 = vmatpush3.bf16.msra.mxu1 %v1132_v26  ;;  %p1306_p1 = por %p1305_p0, %p1304_p13 }
  0x75   :  { %1042 = vmatprep.subr.bf16.mxu1 %v1341_v1 }
  0x76   :  { %288 = vmatpush1.bf16.msra.mxu0 %v1105_v18  ;;  %p1307_p2 = pnand %p1306_p1, %p1300_p12 }
  0x77   :  { %289 = vmatprep.subr.bf16.mxu0 %v1106_v20 }
  0x78   :  { %1043 = vmatpush3.bf16.msra.mxu1 %v1136_v29  ;;  %v1174_v29 = vld [vmem:[#allocation8] sm:$0xff]  }
  0x79   :  { %1044 = vmatprep.subr.bf16.mxu1 %v1341_v1 }
  0x7a   :  { %290 = vmatpush1.bf16.msra.mxu0 %v1108_v21 }
  0x7b   :  { %566 = vmatprep.subr.bf16.mxu0 %v1111_v23 }
  0x7c   :  { %1045 = vmatpush3.bf16.msra.mxu1 %v1140_v32  ;;  %v1176_v32 = vld [vmem:[#allocation8 + $0x8] sm:$0xff]  }
  0x7d   :  { %308 = vmatmul.mubr.bf16.vlgmr.msra.gmra.mrb[0].mxu0 %v97_v24  ;;  %1050 = vmatprep.subr.bf16.mxu1 %v1341_v1 }
  0x7e   :  { %567 = vmatpush1.bf16.msra.mxu0 %v1109_v25 }
  0x7f   :  { %568 = vmatprep.subr.bf16.mxu0 %v1115_v27  ;;  %1047 = vmatmul.mubr.bf16.vlgmr.msra.gmra.mrb[0].mxu1 %v97_v24 }
  0x80   :  { %1066 = vmatprep.mubr.msk.bf16.mxu1 %vm1342_vm0, %v1341_v1  ;;  %1051 = vmatpush3.bf16.msra.mxu1 %v1165_v59 }
  0x81   :  { %1052 = vmatprep.subr.bf16.mxu1 %v1341_v1 }
  0x82   :  { %569 = vmatpush1.bf16.msra.mxu0 %v1113_v28 }
  0x83   :  { %570 = vmatprep.subr.bf16.mxu0 %v1119_v30 }
  0x84   :  { %1053 = vmatpush3.bf16.msra.mxu1 %v1166_v60 }
  0x85   :  { %1054 = vmatprep.subr.bf16.mxu1 %v1341_v1 }
  0x86   :  { %571 = vmatpush1.bf16.msra.mxu0 %v1117_v31  ;;  %v1175_v31 = vld [vmem:[#allocation8 + $0x48] sm:$0xff]  }
  0x87   :  { %572 = vmatprep.subr.bf16.mxu0 %v1123_v33  ;;  %v1177_v33 = vld [vmem:[#allocation8 + $0x50] sm:$0xff]  }
  0x88   :  { %1055 = vmatpush3.bf16.msra.mxu1 %v1167_v61 }
  0x89   :  { %1056 = vmatprep.subr.bf16.mxu1 %v1341_v1 }
  0x8a   :  { %573 = vmatpush1.bf16.msra.mxu0 %v1121_v34  ;;  %v1178_v34 = vld [vmem:[#allocation8 + $0x10] sm:$0xff]  }
  0x8b   :  { %574 = vmatprep.subr.bf16.mxu0 %v1127_v35  ;;  %v1179_v35 = vld [vmem:[#allocation8 + $0x58] sm:$0xff]  }
  0x8c   :  { %1057 = vmatpush3.bf16.msra.mxu1 %v1168_v62 }
  0x8d   :  { %1058 = vmatprep.subr.bf16.mxu1 %v1341_v1 }
  0x8e   :  { %575 = vmatpush1.bf16.msra.mxu0 %v1125_v36  ;;  %v1180_v36 = vld [vmem:[#allocation8 + $0x18] sm:$0xff]  }
  0x8f   :  { %576 = vmatprep.subr.bf16.mxu0 %v1131_v37  ;;  %v1181_v37 = vld [vmem:[#allocation8 + $0x60] sm:$0xff]  }
  0x90   :  { %1059 = vmatpush3.bf16.msra.mxu1 %v1169_v63 }
  0x91   :  { %1060 = vmatprep.subr.bf16.mxu1 %v1341_v1 }
  0x92   :  { %577 = vmatpush1.bf16.msra.mxu0 %v1129_v38  ;;  %v1182_v38 = vld [vmem:[#allocation8 + $0x20] sm:$0xff]  }
  0x93   :  { %578 = vmatprep.subr.bf16.mxu0 %v1135_v39  ;;  %v1183_v39 = vld [vmem:[#allocation8 + $0x68] sm:$0xff]  }
  0x94   :  { %1061 = vmatpush3.bf16.msra.mxu1 %v1170_v0 }
  0x95   :  { %1062 = vmatprep.subr.bf16.mxu1 %v1341_v1 }
  0x96   :  { %579 = vmatpush1.bf16.msra.mxu0 %v1133_v40  ;;  %v1184_v40 = vld [vmem:[#allocation8 + $0x28] sm:$0xff]  }
  0x97   :  { %580 = vmatprep.subr.bf16.mxu0 %v1139_v41  ;;  %v1185_v41 = vld [vmem:[#allocation8 + $0x70] sm:$0xff]  }
  0x98   :  { %1063 = vmatpush3.bf16.msra.mxu1 %v1171_v2 }
  0x99   :  { %1064 = vmatprep.subr.bf16.mxu1 %v1341_v1 }
  0x9a   :  { %581 = vmatpush1.bf16.msra.mxu0 %v1137_v42  ;;  %v1186_v42 = vld [vmem:[#allocation8 + $0x30] sm:$0xff]  }
  0x9b   :  { %582 = vmatprep.subr.bf16.mxu0 %v1143_v43  ;;  %v1187_v43 = vld [vmem:[#allocation8 + $0x78] sm:$0xff]  }
  0x9c   :  { %1065 = vmatpush3.bf16.msra.mxu1 %v1172_v3 }
  0x9d   :  { %1008 = vmatprep.subr.bf16.mxu1 %v1173_v4  ;;  %v989_v4 = vld [vmem:[%s1510_s7] ss:$0 sm:$0xff] }
  0x9e   :  { %583 = vmatpush1.bf16.msra.mxu0 %v1141_v44  ;;  %v1188_v44 = vld [vmem:[#allocation8 + $0x38] sm:$0xff]  }
  0x9f   :  { %584 = vmatprep.subr.bf16.mxu0 %v1146_v45  ;;  %v394_v45 = vld [vmem:[%s1507_s4] sm:$0x3] }
  0xa2   :  { %585 = vmatpush1.bf16.msra.mxu0 %v1144_v46  ;;  %v399_v46 = vrot.slane %v394_v45, %v134_v7 }
  0xa3   :  { %586 = vmatprep.subr.bf16.mxu0 %v1149_v47  ;;  %v403_v47 = vrot.slane %v394_v45, %v138_v9 }
  0xa6   :  { %587 = vmatpush1.bf16.msra.mxu0 %v1147_v48 }
  0xa7   :  { %588 = vmatprep.subr.bf16.mxu0 %v1152_v49 }
  0xaa   :  { %589 = vmatpush1.bf16.msra.mxu0 %v1150_v50 }
  0xab   :  { %590 = vmatprep.subr.bf16.mxu0 %v1155_v51 }
  0xae   :  { %591 = vmatpush1.bf16.msra.mxu0 %v1153_v52 }
  0xaf   :  { %592 = vmatprep.subr.bf16.mxu0 %v1158_v53 }
  0xb2   :  { %593 = vmatpush1.bf16.msra.mxu0 %v1156_v54 }
  0xb3   :  { %594 = vmatprep.subr.bf16.mxu0 %v1161_v55 }
  0xb6   :  { %595 = vmatpush1.bf16.msra.mxu0 %v1159_v56 }
  0xb7   :  { %596 = vmatprep.subr.bf16.mxu0 %v1164_v57 }
  0xba   :  { %597 = vmatpush1.bf16.msra.mxu0 %v1162_v58 }
 0x150   :  { %v309_v12 = vpop.f32.mrb[0].mxu0 }
 0x151   :  { %v310_v13 = vadd.f32 %v309_v12, %v135_v10  ;;  %v311_v14 = vpop.f32.mrb[1].mxu0 }
 0x152   :  { %v312_v15 = vadd.f32 %v311_v14, %v139_v11  ;;  %v313_v16 = vpop.f32.mrb[2].mxu0  ;;  %v350_v23 = vpop.f32.mrb[0].mxu1 }
 0x153   :  { %v356_v17 = vmax.f32 %v310_v13, 0.0  ;;  %v314_v1 = vpop.f32.mrb[3].mxu0  ;;  %v351_v24 = vadd.f32 %v350_v23, %v143_v22  ;;  %v1048_v25 = vpop.f32.mrb[1].mxu1 }
 0x154   :  { %v357_v18 = vmax.f32 %v312_v15, 0.0  ;;  %v353_v26 = vpop.f32.mrb[2].mxu1 }
 0x155   :  { %v359_v21 = vpack.c.bf16 %v356_v17, %v356_v17  ;;  %v358_v27 = vmax.f32 %v351_v24, 0.0  ;;  %v1049_v28 = vpop.f32.mrb[3].mxu1 }
 0x156   :  { %v360_v20 = vpack.c.bf16 %v357_v18, %v357_v18 }
 0x157   :  { %v361_v30 = vpack.c.bf16 %v358_v27, %v358_v27 }
 0x158   :  { %598 = vmatprep.mubr.bf16.mxu0 %v360_v20 }
 0x159   :  { %599 = vmatmul.mubr.bf16.vlgmr.msra.gmra.mrb[4].mxu0 %v359_v21  ;;  %1067 = vmatmul.mubr.bf16.vlgmr.msra.gmra.mrb[4].mxu1 %v361_v30 }
 0x15a   :  { %1009 = vmatpush3.bf16.msra.mxu1 %v1174_v29 }
 0x15b   :  { %1010 = vmatprep.subr.bf16.mxu1 %v1175_v31 }
 0x15e   :  { %1011 = vmatpush3.bf16.msra.mxu1 %v1176_v32 }
 0x15f   :  { %1012 = vmatprep.subr.bf16.mxu1 %v1177_v33 }
 0x162   :  { %1013 = vmatpush3.bf16.msra.mxu1 %v1178_v34 }
 0x163   :  { %1014 = vmatprep.subr.bf16.mxu1 %v1179_v35 }
 0x166   :  { %1015 = vmatpush3.bf16.msra.mxu1 %v1180_v36 }
 0x167   :  { %1016 = vmatprep.subr.bf16.mxu1 %v1181_v37 }
 0x16a   :  { %1017 = vmatpush3.bf16.msra.mxu1 %v1182_v38 }
 0x16b   :  { %1018 = vmatprep.subr.bf16.mxu1 %v1183_v39 }
 0x16e   :  { %1019 = vmatpush3.bf16.msra.mxu1 %v1184_v40 }
 0x16f   :  { %1020 = vmatprep.subr.bf16.mxu1 %v1185_v41 }
 0x172   :  { %1021 = vmatpush3.bf16.msra.mxu1 %v1186_v42 }
 0x173   :  { %1022 = vmatprep.subr.bf16.mxu1 %v1187_v43 }
 0x176   :  { %1023 = vmatpush3.bf16.msra.mxu1 %v1188_v44 }
 0x22c   :  { %v600_v48 = vpop.f32.mrb[4].mxu0  ;;  %v741_v58 = vpop.f32.mrb[4].mxu1 }
 0x22d   :  { %v601_v49 = vadd.f32 %v600_v48, %v399_v46  ;;  %v602_v50 = vpop.f32.mrb[5].mxu0  ;;  %v1068_v59 = vpop.f32.mrb[5].mxu1 }
 0x22e   :  { %v603_v51 = vadd.f32 %v602_v50, %v403_v47  ;;  %v604_v52 = vpop.f32.mrb[6].mxu0  ;;  %v744_v60 = vpop.f32.mrb[6].mxu1 }
 0x22f   :  { %v607_v53 = vmax.f32 %v601_v49, 0.0  ;;  %v605_v54 = vpop.f32.mrb[7].mxu0  ;;  %v1069_v61 = vpop.f32.mrb[7].mxu1 }
 0x230   :  { %v608_v55 = vmax.f32 %v603_v51, 0.0 }
 0x231   :  { %v609_v57 = vpack.c.bf16 %v607_v53, %v607_v53 }
 0x232   :  { %v610_v56 = vpack.c.bf16 %v608_v55, %v608_v55 }
 0x234   :  { %875 = vmatprep.mubr.bf16.mxu1 %v610_v56 }
 0x235   :  { %876 = vmatmul.mubr.bf16.vlgmr.msra.gmra.mrb[8].mxu1 %v609_v57 }
 0x308   :  { %v1024_v62 = vpop.f32.mrb[8].mxu1 }
 0x309   :  { %v1025_v63 = vpop.f32.mrb[9].mxu1 }
 0x30a   :  { %v1026_v0 = vadd.f32 %v1025_v63, %v1024_v62  ;;  %v1027_v2 = vpop.f32.mrb[10].mxu1 }
 0x30b   :  { %v1028_v3 = vpop.f32.mrb[11].mxu1 }
 0x30c   :  { %v878_v5 = vadd.f32 %v1026_v0, %v741_v58 }
 0x30e   :  { %v890_v6 = vadd.f32 %v989_v4, %v878_v5 }
 0x310   :  { %891 = vst [vmem:[#allocation11] sm:$0xff] %v890_v6 }
 0x311   :  { %1310 = shalt.err (!%p1307_p2)
}
 0x312   :  { %s1311_s30 = scalar_lea.hbm %s1511_s8, 128 }
 0x313   :  { %p1312_p3 = scmp.ne.s32.totalorder %s1511_s8, %s1311_s30  ;;  %p1315_p4 = scmp.lt.u32.totalorder %s1311_s30, %s1511_s8 }
 0x315   :  { %p1317_p5 = pnand %p1315_p4, %p1312_p3 }
 0x317   :  { %1320 = shalt.err (!%p1317_p5)
}
 0x318   :  { %901 = dma.vmem_to_hbm [thread:$0]  %s899_s25, 128, %s1511_s8, [#allocation4]  }
 0x319   :  { %1327 = dma.done.wait [#allocation4], 128  }
 0x31a   :  { %1328 = vsyncadd [#allocation4], 4294967168 }
 0x31b   :  { %905 = vsyncpa [#allocation3], 1 }
 0x31c   :  { %906 = vsyncpa [#allocation6], 1 }
 0x31d   :  { %907 = vsyncpa [#allocation9], 1 }
 0x31e   :  { %908 = vsyncpa [#allocation4], 1 }

</bundles_post_ra>
